<compile_context>
chip_gen: v7x
topology: tpu7x:2x2x1
jax: 0.10.0
libtpu: 0.0.40
codegen_flags: <defaults>
</compile_context>

<pallas_src>
import jax
import jax.numpy as jnp
from jax.experimental import pallas as pl
from jax.experimental.pallas import tpu as pltpu


def _make_kernel(W, Cp, compute_dtype):
    # Tap order must match the weight layout built in the wrapper: (ky, kx) row-major,
    # shift = (ky - 1, kx - 1).
    SHIFTS = [(sy, sx) for sy in (-1, 0, 1) for sx in (-1, 0, 1)]

    def kernel(x_ref, w_ref, b_ref, m_ref, o_ref):
        # x_ref: (Cp, Lb)    activations, channel-major, batch*spatial on lanes (f32)
        # w_ref: (Cp, 9*Cp)  fused conv weight, tap-major along K (compute dtype)
        # b_ref: (Cp, 1)     conv bias (f32)
        # m_ref: (8, Lb)     {0,1} boundary masks for the 8 non-center taps (f32)
        # o_ref: (Cp, Lb)    output block (lane-dense, unmasked stores)
        x = x_ref[...]
        w = w_ref[...]
        masks = m_ref[...]
        Lb = x.shape[1]

        # Hoisted once and reused by both convs (avoids two materialized broadcasts per step).
        bias_b = jnp.broadcast_to(b_ref[...], (Cp, Lb))

        def im2col(a):
            # a: (Cp, Lb) f32 -> (9*Cp, Lb) compute_dtype.  SAME zero-padding via lane rolls
            # (XLU) + precomputed {0,1} masks (one VPU multiply per non-center tap).
            parts = []
            mi = 0
            for (sy, sx) in SHIFTS:
                s = sy * W + sx                    # forward read offset in flat index
                if s == 0:
                    shifted = a
                else:
                    shifted = pltpu.roll(a, (-s) % Lb, axis=1) * masks[mi:mi + 1, :]
                    mi += 1
                parts.append(shifted)
            # TODO(synk): at large H*W, build the taps into a reused VMEM scratch instead of
            # materializing this concatenate twice (VMEM / vst-slot limiter on v7x's 64 MiB).
            return jnp.concatenate(parts, axis=0).astype(compute_dtype)

        # --- conv #1 + ReLU: single MXU matmul, f32 accumulation -----------------------------
        h1 = jnp.maximum(
            jnp.dot(w, im2col(x), preferred_element_type=jnp.float32) + bias_b, 0.0)

        # --- conv #2 (same weight/bias) + residual + ReLU -------------------------------------
        o_ref[...] = jnp.maximum(
            jnp.dot(w, im2col(h1), preferred_element_type=jnp.float32) + bias_b + x, 0.0)

    return kernel


def residual_block(x_nchw, weight_oihw, bias, *, use_bf16_operands=False):
    """x_nchw: (N, C, H, W) f32; weight_oihw: (C, C, 3, 3); bias: (C,).

    use_bf16_operands: cast the two MXU matmul operands to bfloat16 (f32 accumulation).
    Recommended on v6e / v7x once C / H*W are large enough to be MXU-bound; keep False on
    v5e or when tight f32 accuracy is required.
    """
    N, C, H, W = x_nchw.shape
    HW = H * W

    compute_dtype = jnp.bfloat16 if use_bf16_operands else jnp.float32
    c_align = 16 if use_bf16_operands else 8            # bf16 packs 2 rows per sublane
    Cp = ((C + c_align - 1) // c_align) * c_align
    HW_pad = ((HW + 127) // 128) * 128                  # lane-dense stores for any H, W

    # --- how many images share one lane block ---------------------------------------------
    # Big lane blocks amortize per-grid-step overhead and MXU fill/drain; cap the block so the
    # 9x im2col blow-up stays small vs VMEM, and prefer >= 2 parallel programs (v7x has two
    # TensorCores) when each block still gets >= 512 lanes.
    max_lanes_per_block = 8192
    imgs_per_block = max(1, min(N, max_lanes_per_block // HW_pad))
    while (imgs_per_block > 1
           and -(-N // imgs_per_block) < 2
           and (imgs_per_block // 2) * HW_pad >= 512):
        imgs_per_block //= 2
    n_blocks = -(-N // imgs_per_block)
    N_pad = n_blocks * imgs_per_block
    Lb = imgs_per_block * HW_pad                        # lanes per block (multiple of 128)
    L_total = n_blocks * Lb

    # --- activations: NCHW -> (Cp, N_pad*HW_pad); batch folded into the lane axis -----------
    x_f = x_nchw.astype(jnp.float32).reshape(N, C, HW)
    x_f = jnp.pad(x_f, ((0, N_pad - N), (0, Cp - C), (0, HW_pad - HW)))   # (N_pad, Cp, HW_pad)
    x_cm = jnp.transpose(x_f, (1, 0, 2)).reshape(Cp, L_total)             # (Cp, L_total)

    # --- fused weight: OIHW -> (Cp, 9*Cp), K ordered (ky, kx, ci) tap-major ------------------
    w_t = jnp.transpose(weight_oihw.astype(jnp.float32), (0, 2, 3, 1))    # (C, 3, 3, C)
    w_t = jnp.pad(w_t, ((0, Cp - C), (0, 0), (0, 0), (0, Cp - C)))        # (Cp, 3, 3, Cp)
    w_big = w_t.reshape(Cp, 9 * Cp).astype(compute_dtype)

    b_p = jnp.pad(bias.astype(jnp.float32), (0, Cp - C)).reshape(Cp, 1)   # (Cp, 1)

    # --- precomputed {0,1} boundary masks for the 8 non-center taps --------------------------
    # Derived from the per-image flat position so cross-image / block-edge roll wrap-around
    # only ever lands on positions these masks zero out.  Same for every block.
    p = jnp.arange(Lb, dtype=jnp.int32)
    q = p % HW_pad
    y = q // W
    xc = q % W
    inside = q < HW
    rows = []
    for sy in (-1, 0, 1):
        for sx in (-1, 0, 1):
            if sy == 0 and sx == 0:
                continue
            ok = inside & (y + sy >= 0) & (y + sy < H) & (xc + sx >= 0) & (xc + sx < W)
            rows.append(ok)
    masks = jnp.stack(rows, axis=0).astype(jnp.float32)                   # (8, Lb)

    kernel = _make_kernel(W, Cp, compute_dtype)

    # Explicit VMEM budget (review: v7x has 64 MiB physical / 32 MiB default scoped).
    esize = 2 if use_bf16_operands else 4
    footprint = (2 * 2 * Cp * Lb * 4                        # x/out blocks, double-buffered
                 + Cp * 9 * Cp * esize + Cp * 4 + 8 * Lb * 4    # weights, bias, masks
                 + 2 * 9 * Cp * Lb * esize)                 # im2col intermediates
    vmem_limit = int(min(48 * 1024 * 1024, max(16 * 1024 * 1024, 4 * footprint)))

    out_p = pl.pallas_call(
        kernel,
        out_shape=jax.ShapeDtypeStruct((Cp, L_total), jnp.float32),
        grid_spec=pltpu.PrefetchScalarGridSpec(
            num_scalar_prefetch=0,
            grid=(n_blocks,),
            in_specs=[
                pl.BlockSpec((Cp, Lb), lambda g: (0, g)),         # activations (lane block)
                pl.BlockSpec((Cp, 9 * Cp), lambda g: (0, 0)),     # stationary fused weight
                pl.BlockSpec((Cp, 1), lambda g: (0, 0)),          # bias
                pl.BlockSpec((8, Lb), lambda g: (0, 0)),          # boundary masks (constant)
            ],
            out_specs=pl.BlockSpec((Cp, Lb), lambda g: (0, g)),
        ),
        compiler_params=pltpu.CompilerParams(
            dimension_semantics=("parallel",),
            vmem_limit_bytes=vmem_limit,
        ),
    )(x_cm, w_big, b_p, masks)

    # Drop lane/channel/batch padding, restore NCHW (cheap wrapper-side reshapes).
    out = out_p.reshape(Cp, N_pad, HW_pad)
    out = jnp.transpose(out, (1, 0, 2))[:N, :C, :HW]
    return out.reshape(N, C, H, W)


def _reference(x, w, b):
    def conv(v):
        y = jax.lax.conv_general_dilated(
            v, w, window_strides=(1, 1), padding="SAME",
            dimension_numbers=("NCHW", "OIHW", "NCHW"))
        return y + b[None, :, None, None]
    h = jnp.maximum(conv(x), 0.0)
    return jnp.maximum(conv(h) + x, 0.0)


if __name__ == "__main__":
    key = jax.random.PRNGKey(0)
    k_x, k_w, k_b = jax.random.split(key, 3)

    N, C, H, W = 2, 4, 16, 16
    x = jax.random.normal(k_x, (N, C, H, W), dtype=jnp.float32)
    # Deterministic synthetic parameters (PyTorch Conv2d shapes: (Cout, Cin, 3, 3), (Cout,))
    fan_in = C * 3 * 3
    weight = jax.random.uniform(k_w, (C, C, 3, 3), jnp.float32,
                                minval=-1.0, maxval=1.0) * (1.0 / fan_in ** 0.5)
    bias = jax.random.uniform(k_b, (C,), jnp.float32,
                              minval=-1.0, maxval=1.0) * (1.0 / fan_in ** 0.5)

    ref = _reference(x, weight, bias)

    # f32 path (default; matches reference tightly).
    out = jax.block_until_ready(residual_block(x, weight, bias))
    assert out.shape == (N, C, H, W)
    assert jnp.allclose(out, ref, atol=5e-4, rtol=5e-4), "f32 kernel mismatch vs reference"

    # bf16-operand path (v6e / v7x MXU-friendly); looser tolerance for bf16 operand rounding.
    out_bf16 = jax.block_until_ready(residual_block(x, weight, bias, use_bf16_operands=True))
    assert jnp.allclose(out_bf16, ref, atol=5e-2, rtol=5e-2), "bf16 kernel mismatch vs reference"

    print("KERNEL_OK")
</pallas_src>

<mosaic_0001>
module attributes {stable_mosaic.version = 11 : i64} {
  func.func @kernel(%arg0: i32, %arg1: memref<8x512xf32, #tpu.memory_space<vmem>>, %arg2: memref<8x72xf32, #tpu.memory_space<vmem>>, %arg3: memref<8x1xf32, #tpu.memory_space<vmem>>, %arg4: memref<8x512xf32, #tpu.memory_space<vmem>>, %arg5: memref<8x512xf32, #tpu.memory_space<vmem>>) attributes {dimension_semantics = [#tpu.dimension_semantics<parallel>], iteration_bounds = array<i64: 1>, scalar_prefetch = 0 : i64, scratch_operands = 0 : i64, tpu.core_type = #tpu.core_type<tc>, window_params = [{transform_indices = @transform_0, window_bounds = array<i64: 8, 512>}, {pipeline_mode = #tpu.pipeline_mode<synchronous>, transform_indices = @transform_1, window_bounds = array<i64: 8, 72>}, {pipeline_mode = #tpu.pipeline_mode<synchronous>, transform_indices = @transform_2, window_bounds = array<i64: 8, 1>}, {pipeline_mode = #tpu.pipeline_mode<synchronous>, transform_indices = @transform_3, window_bounds = array<i64: 8, 512>}, {transform_indices = @transform_4, window_bounds = array<i64: 8, 512>}]} {
    %c0 = arith.constant 0 : index
    %c0_0 = arith.constant 0 : index
    %0 = vector.load %arg1[%c0, %c0_0] : memref<8x512xf32, #tpu.memory_space<vmem>>, vector<8x512xf32>
    %c0_1 = arith.constant 0 : index
    %c0_2 = arith.constant 0 : index
    %1 = vector.load %arg2[%c0_1, %c0_2] : memref<8x72xf32, #tpu.memory_space<vmem>>, vector<8x72xf32>
    %c0_3 = arith.constant 0 : index
    %c0_4 = arith.constant 0 : index
    %2 = vector.load %arg4[%c0_3, %c0_4] : memref<8x512xf32, #tpu.memory_space<vmem>>, vector<8x512xf32>
    %c0_5 = arith.constant 0 : index
    %c0_6 = arith.constant 0 : index
    %3 = vector.load %arg3[%c0_5, %c0_6] : memref<8x1xf32, #tpu.memory_space<vmem>>, vector<8x1xf32>
    %4 = vector.shape_cast %3 : vector<8x1xf32> to vector<8x1xf32>
    %5 = vector.broadcast %4 : vector<8x1xf32> to vector<8x512xf32>
    %c17_i32 = arith.constant 17 : i32
    %6 = tpu.dynamic_rotate %0 by %c17_i32 dim 1 : vector<8x512xf32>, i32 -> vector<8x512xf32>
    %7 = vector.extract_strided_slice %2 {offsets = [0, 0], sizes = [1, 512], strides = [1, 1]} : vector<8x512xf32> to vector<1x512xf32>
    %8 = vector.broadcast %7 : vector<1x512xf32> to vector<8x512xf32>
    %9 = arith.mulf %6, %8 : vector<8x512xf32>
    %c16_i32 = arith.constant 16 : i32
    %10 = tpu.dynamic_rotate %0 by %c16_i32 dim 1 : vector<8x512xf32>, i32 -> vector<8x512xf32>
    %11 = vector.extract_strided_slice %2 {offsets = [1, 0], sizes = [1, 512], strides = [1, 1]} : vector<8x512xf32> to vector<1x512xf32>
    %12 = vector.broadcast %11 : vector<1x512xf32> to vector<8x512xf32>
    %13 = arith.mulf %10, %12 : vector<8x512xf32>
    %c15_i32 = arith.constant 15 : i32
    %14 = tpu.dynamic_rotate %0 by %c15_i32 dim 1 : vector<8x512xf32>, i32 -> vector<8x512xf32>
    %15 = vector.extract_strided_slice %2 {offsets = [2, 0], sizes = [1, 512], strides = [1, 1]} : vector<8x512xf32> to vector<1x512xf32>
    %16 = vector.broadcast %15 : vector<1x512xf32> to vector<8x512xf32>
    %17 = arith.mulf %14, %16 : vector<8x512xf32>
    %c1_i32 = arith.constant 1 : i32
    %18 = tpu.dynamic_rotate %0 by %c1_i32 dim 1 : vector<8x512xf32>, i32 -> vector<8x512xf32>
    %19 = vector.extract_strided_slice %2 {offsets = [3, 0], sizes = [1, 512], strides = [1, 1]} : vector<8x512xf32> to vector<1x512xf32>
    %20 = vector.broadcast %19 : vector<1x512xf32> to vector<8x512xf32>
    %21 = arith.mulf %18, %20 : vector<8x512xf32>
    %c511_i32 = arith.constant 511 : i32
    %22 = tpu.dynamic_rotate %0 by %c511_i32 dim 1 : vector<8x512xf32>, i32 -> vector<8x512xf32>
    %23 = vector.extract_strided_slice %2 {offsets = [4, 0], sizes = [1, 512], strides = [1, 1]} : vector<8x512xf32> to vector<1x512xf32>
    %24 = vector.broadcast %23 : vector<1x512xf32> to vector<8x512xf32>
    %25 = arith.mulf %22, %24 : vector<8x512xf32>
    %c497_i32 = arith.constant 497 : i32
    %26 = tpu.dynamic_rotate %0 by %c497_i32 dim 1 : vector<8x512xf32>, i32 -> vector<8x512xf32>
    %27 = vector.extract_strided_slice %2 {offsets = [5, 0], sizes = [1, 512], strides = [1, 1]} : vector<8x512xf32> to vector<1x512xf32>
    %28 = vector.broadcast %27 : vector<1x512xf32> to vector<8x512xf32>
    %29 = arith.mulf %26, %28 : vector<8x512xf32>
    %c496_i32 = arith.constant 496 : i32
    %30 = tpu.dynamic_rotate %0 by %c496_i32 dim 1 : vector<8x512xf32>, i32 -> vector<8x512xf32>
    %31 = vector.extract_strided_slice %2 {offsets = [6, 0], sizes = [1, 512], strides = [1, 1]} : vector<8x512xf32> to vector<1x512xf32>
    %32 = vector.broadcast %31 : vector<1x512xf32> to vector<8x512xf32>
    %33 = arith.mulf %30, %32 : vector<8x512xf32>
    %c495_i32 = arith.constant 495 : i32
    %34 = tpu.dynamic_rotate %0 by %c495_i32 dim 1 : vector<8x512xf32>, i32 -> vector<8x512xf32>
    %35 = vector.extract_strided_slice %2 {offsets = [7, 0], sizes = [1, 512], strides = [1, 1]} : vector<8x512xf32> to vector<1x512xf32>
    %36 = vector.broadcast %35 : vector<1x512xf32> to vector<8x512xf32>
    %37 = arith.mulf %34, %36 : vector<8x512xf32>
    %38 = tpu.concatenate %9, %13, %17, %21, %0, %25, %29, %33, %37 in 0 : vector<8x512xf32>, vector<8x512xf32>, vector<8x512xf32>, vector<8x512xf32>, vector<8x512xf32>, vector<8x512xf32>, vector<8x512xf32>, vector<8x512xf32>, vector<8x512xf32> -> vector<72x512xf32>
    %cst = arith.constant dense<0.000000e+00> : vector<8x512xf32>
    %39 = tpu.matmul %1, %38, %cst {dimension_numbers = #tpu.dot_dimension_numbers<[1], [0], [0], [1], [0, 0, 1, 1], [], []>} : vector<8x72xf32>, vector<72x512xf32>, vector<8x512xf32> -> vector<8x512xf32>
    %40 = arith.addf %39, %5 : vector<8x512xf32>
    %cst_7 = arith.constant 0.000000e+00 : f32
    %41 = vector.broadcast %cst_7 : f32 to vector<8x512xf32>
    %42 = arith.maximumf %40, %41 : vector<8x512xf32>
    %c17_i32_8 = arith.constant 17 : i32
    %43 = tpu.dynamic_rotate %42 by %c17_i32_8 dim 1 : vector<8x512xf32>, i32 -> vector<8x512xf32>
    %44 = vector.extract_strided_slice %2 {offsets = [0, 0], sizes = [1, 512], strides = [1, 1]} : vector<8x512xf32> to vector<1x512xf32>
    %45 = vector.broadcast %44 : vector<1x512xf32> to vector<8x512xf32>
    %46 = arith.mulf %43, %45 : vector<8x512xf32>
    %c16_i32_9 = arith.constant 16 : i32
    %47 = tpu.dynamic_rotate %42 by %c16_i32_9 dim 1 : vector<8x512xf32>, i32 -> vector<8x512xf32>
    %48 = vector.extract_strided_slice %2 {offsets = [1, 0], sizes = [1, 512], strides = [1, 1]} : vector<8x512xf32> to vector<1x512xf32>
    %49 = vector.broadcast %48 : vector<1x512xf32> to vector<8x512xf32>
    %50 = arith.mulf %47, %49 : vector<8x512xf32>
    %c15_i32_10 = arith.constant 15 : i32
    %51 = tpu.dynamic_rotate %42 by %c15_i32_10 dim 1 : vector<8x512xf32>, i32 -> vector<8x512xf32>
    %52 = vector.extract_strided_slice %2 {offsets = [2, 0], sizes = [1, 512], strides = [1, 1]} : vector<8x512xf32> to vector<1x512xf32>
    %53 = vector.broadcast %52 : vector<1x512xf32> to vector<8x512xf32>
    %54 = arith.mulf %51, %53 : vector<8x512xf32>
    %c1_i32_11 = arith.constant 1 : i32
    %55 = tpu.dynamic_rotate %42 by %c1_i32_11 dim 1 : vector<8x512xf32>, i32 -> vector<8x512xf32>
    %56 = vector.extract_strided_slice %2 {offsets = [3, 0], sizes = [1, 512], strides = [1, 1]} : vector<8x512xf32> to vector<1x512xf32>
    %57 = vector.broadcast %56 : vector<1x512xf32> to vector<8x512xf32>
    %58 = arith.mulf %55, %57 : vector<8x512xf32>
    %c511_i32_12 = arith.constant 511 : i32
    %59 = tpu.dynamic_rotate %42 by %c511_i32_12 dim 1 : vector<8x512xf32>, i32 -> vector<8x512xf32>
    %60 = vector.extract_strided_slice %2 {offsets = [4, 0], sizes = [1, 512], strides = [1, 1]} : vector<8x512xf32> to vector<1x512xf32>
    %61 = vector.broadcast %60 : vector<1x512xf32> to vector<8x512xf32>
    %62 = arith.mulf %59, %61 : vector<8x512xf32>
    %c497_i32_13 = arith.constant 497 : i32
    %63 = tpu.dynamic_rotate %42 by %c497_i32_13 dim 1 : vector<8x512xf32>, i32 -> vector<8x512xf32>
    %64 = vector.extract_strided_slice %2 {offsets = [5, 0], sizes = [1, 512], strides = [1, 1]} : vector<8x512xf32> to vector<1x512xf32>
    %65 = vector.broadcast %64 : vector<1x512xf32> to vector<8x512xf32>
    %66 = arith.mulf %63, %65 : vector<8x512xf32>
    %c496_i32_14 = arith.constant 496 : i32
    %67 = tpu.dynamic_rotate %42 by %c496_i32_14 dim 1 : vector<8x512xf32>, i32 -> vector<8x512xf32>
    %68 = vector.extract_strided_slice %2 {offsets = [6, 0], sizes = [1, 512], strides = [1, 1]} : vector<8x512xf32> to vector<1x512xf32>
    %69 = vector.broadcast %68 : vector<1x512xf32> to vector<8x512xf32>
    %70 = arith.mulf %67, %69 : vector<8x512xf32>
    %c495_i32_15 = arith.constant 495 : i32
    %71 = tpu.dynamic_rotate %42 by %c495_i32_15 dim 1 : vector<8x512xf32>, i32 -> vector<8x512xf32>
    %72 = vector.extract_strided_slice %2 {offsets = [7, 0], sizes = [1, 512], strides = [1, 1]} : vector<8x512xf32> to vector<1x512xf32>
    %73 = vector.broadcast %72 : vector<1x512xf32> to vector<8x512xf32>
    %74 = arith.mulf %71, %73 : vector<8x512xf32>
    %75 = tpu.concatenate %46, %50, %54, %58, %42, %62, %66, %70, %74 in 0 : vector<8x512xf32>, vector<8x512xf32>, vector<8x512xf32>, vector<8x512xf32>, vector<8x512xf32>, vector<8x512xf32>, vector<8x512xf32>, vector<8x512xf32>, vector<8x512xf32> -> vector<72x512xf32>
    %cst_16 = arith.constant dense<0.000000e+00> : vector<8x512xf32>
    %76 = tpu.matmul %1, %75, %cst_16 {dimension_numbers = #tpu.dot_dimension_numbers<[1], [0], [0], [1], [0, 0, 1, 1], [], []>} : vector<8x72xf32>, vector<72x512xf32>, vector<8x512xf32> -> vector<8x512xf32>
    %77 = arith.addf %76, %5 : vector<8x512xf32>
    %78 = arith.addf %77, %0 : vector<8x512xf32>
    %cst_17 = arith.constant 0.000000e+00 : f32
    %79 = vector.broadcast %cst_17 : f32 to vector<8x512xf32>
    %80 = arith.maximumf %78, %79 : vector<8x512xf32>
    %c0_18 = arith.constant 0 : index
    %c0_19 = arith.constant 0 : index
    %81 = vector.load %arg5[%c0_18, %c0_19] : memref<8x512xf32, #tpu.memory_space<vmem>>, vector<8x512xf32>
    tpu.vector_store %arg5[%c0_18, %c0_19], %80 {strides = array<i32>} : memref<8x512xf32, #tpu.memory_space<vmem>>, vector<8x512xf32>,
    return
  }
  func.func @transform_0(%arg0: i32) -> (i32, i32) {
    %c0_i32 = arith.constant 0 : i32
    %c0_i32_0 = arith.constant 0 : i32
    return %c0_i32, %arg0 : i32, i32
  }
  func.func @transform_1(%arg0: i32) -> (i32, i32) {
    %c0_i32 = arith.constant 0 : i32
    %c0_i32_0 = arith.constant 0 : i32
    %c0_i32_1 = arith.constant 0 : i32
    return %c0_i32, %c0_i32_0 : i32, i32
  }
  func.func @transform_2(%arg0: i32) -> (i32, i32) {
    %c0_i32 = arith.constant 0 : i32
    %c0_i32_0 = arith.constant 0 : i32
    %c0_i32_1 = arith.constant 0 : i32
    return %c0_i32, %c0_i32_0 : i32, i32
  }
  func.func @transform_3(%arg0: i32) -> (i32, i32) {
    %c0_i32 = arith.constant 0 : i32
    %c0_i32_0 = arith.constant 0 : i32
    %c0_i32_1 = arith.constant 0 : i32
    return %c0_i32, %c0_i32_0 : i32, i32
  }
  func.func @transform_4(%arg0: i32) -> (i32, i32) {
    %c0_i32 = arith.constant 0 : i32
    %c0_i32_0 = arith.constant 0 : i32
    return %c0_i32, %arg0 : i32, i32
  }
}

</mosaic_0001>

<bundles_post_ra>
// kernel: tpu_custom_call.1
= control target key start
LH: loop header
LB: loop body
LE: loop exit
PB: predicated region body
PF: predicated region fallthrough
CT: control target
= control target key end

     0   :  { %9 = vsyncpa [#allocation3], 0  ;;  %s1501_s0 = inlined_call_operand.hbm [shape: f32[8,512], index: 0, kind: input, shape index: {}]   ;;  %s1502_s1 = inlined_call_operand.vmem [shape: f32[8,72], index: 1, kind: input, shape index: {}]   ;;  %s1503_s2 = inlined_call_operand.vmem [shape: f32[8,1], index: 2, kind: input, shape index: {}]   ;;  %s1504_s3 = inlined_call_operand.hbm [shape: f32[8,512], index: 3, kind: input, shape index: {}]   ;;  %s1505_s4 = inlined_call_operand.hbm [shape: f32[8,512], index: 4, kind: output, shape index: {}]  }
   0x1   :  { %10 = vsyncpa [#allocation6], 0 }
   0x2   :  { %11 = vsyncpa [#allocation4], 0  ;;  %s925_s15 = smov [#allocation2]   ;;  %s926_s17 = smov [#allocation5]  }
   0x3   :  { %s18_s16 = sshll.u32 %s925_s15, 4  ;;  %s32_s18 = sshll.u32 %s926_s17, 4  ;;  %s19_s16 = int_to_ptr.vmem [resolvable:$true] %s18_s16  ;;  %s33_s18 = int_to_ptr.vmem [resolvable:$true] %s32_s18 }
   0x4   :  { %s853_s21 = scalar_lea.hbm %s1501_s0, 512 }
   0x5   :  { %p854_p0 = scmp.ne.s32.totalorder %s1501_s0, %s853_s21  ;;  %p857_p1 = scmp.lt.u32.totalorder %s853_s21, %s1501_s0 }
   0x7   :  { %p859_p2 = pnand %p857_p1, %p854_p0 }
   0x9   :  { %862 = shalt.err (!%p859_p2)
}
   0xa   :  { %s863_s26 = scalar_lea.vmem %s19_s16, 512  ;;  %p868_p4 = scmp.lt.s32.totalorder %s19_s16, %s19_s16 }
   0xb   :  { %p864_p3 = scmp.ne.s32.totalorder %s19_s16, %s863_s26  ;;  %p869_p5 = scmp.lt.s32.totalorder %s863_s26, %s863_s26 }
   0xd   :  { %p870_p6 = por %p869_p5, %p868_p4 }
   0xf   :  { %p871_p7 = pnand %p870_p6, %p864_p3 }
  0x11   :  { %874 = shalt.err (!%p871_p7)
}
  0x12   :  { %21 = dma.hbm_to_vmem [thread:$0]  %s1501_s0, 512, %s19_s16, [#allocation3]  }
  0x13   :  { %s875_s5 = scalar_lea.hbm %s1504_s3, 512 }
  0x14   :  { %p876_p8 = scmp.ne.s32.totalorder %s1504_s3, %s875_s5  ;;  %p879_p9 = scmp.lt.u32.totalorder %s875_s5, %s1504_s3 }
  0x16   :  { %p881_p10 = pnand %p879_p9, %p876_p8 }
  0x18   :  { %884 = shalt.err (!%p881_p10)
}
  0x19   :  { %s885_s10 = scalar_lea.vmem %s33_s18, 512  ;;  %p890_p12 = scmp.lt.s32.totalorder %s33_s18, %s33_s18 }
  0x1a   :  { %p886_p11 = scmp.ne.s32.totalorder %s33_s18, %s885_s10  ;;  %p891_p13 = scmp.lt.s32.totalorder %s885_s10, %s885_s10 }
  0x1c   :  { %p892_p0 = por %p891_p13, %p890_p12 }
  0x1e   :  { %p893_p1 = pnand %p892_p0, %p886_p11 }
  0x20   :  { %896 = shalt.err (!%p893_p1)
}
  0x21   :  { %35 = dma.hbm_to_vmem [thread:$0]  %s1504_s3, 512, %s33_s18, [#allocation6]  }
  0x22   :  { %919 = dma.done.wait [#allocation3], 512  }
  0x23   :  { %920 = vsyncadd [#allocation3], 4294966784 }
  0x24   :  { %921 = dma.done.wait [#allocation6], 512  }
  0x25   :  { %922 = vsyncadd [#allocation6], 4294966784  ;;  %v987_v0 = vld [vmem:[#allocation2 + $0x10] sm:$0xff]  ;;  %v989_v1 = vld [vmem:[#allocation2] sm:$0xff]  ;;  %s927_s12 = smov 17   ;;  %s928_s3 = smov 16   ;;  %v65_v7 = vlaneseq }
  0x26   :  { %61 = vrot.lane.b32.xlu1 %v987_v0, %s927_s12  ;;  %57 = vrot.lane.b32.xlu0 %v989_v1, %s927_s12  ;;  %v995_v2 = vld [vmem:[#allocation2 + $0x18] sm:$0xff]  ;;  %v997_v3 = vld [vmem:[#allocation2 + $0x8] sm:$0xff]  ;;  %s929_s13 = smov 15   ;;  %s930_s14 = smov 1   ;;  %v934_v4 = vmov 0.0   ;;  %v935_v5 = vmov 0  }
  0x27   :  { %s931_s15 = smov 127   ;;  %s932_s16 = smov 113   ;;  %391 = vmatprep.mubr.f32.mxu0 %v934_v4  ;;  %462 = vmatprep.mubr.f32.mxu1 %v934_v4  ;;  %v51_v6 = vld [vmem:[%s1503_s2] sm:$0xff]  ;;  %v1064_v8 = vshrl.u32 %v65_v7, 7  ;;  %v1066_v11 = vand.u32 127, %v65_v7  ;;  %v1070_v14 = vld [vmem:[#allocation5 + $0x8] sm:$0xff] }
  0x28   :  { %s933_s17 = smov 112   ;;  %852 = vset.pattern.permute.xlu0 %v935_v5  ;;  %s936_s18 = smov 111   ;;  %v1073_v17 = vld [vmem:[#allocation5] sm:$0xff]  ;;  %v1075_v18 = vld [vmem:[#allocation5 + $0x10] sm:$0xff]  ;;  %v1084_v21 = vld [vmem:[#allocation5 + $0x18] sm:$0xff]  ;;  %vm323_vm8 = vcmask 588800  }
  0x29   :  { %v74_v12 = vsub.s32 0, %v1064_v8  ;;  %v107_v13 = vsub.s32 1, %v1064_v8  ;;  %vm67_vm0 = vcmp.lt.s32.totalorder %v1066_v11, 17  ;;  %vm100_vm1 = vcmp.lt.s32.totalorder %v1066_v11, 16 }
  0x2a   :  { %63 = vrot.lane.b32.xlu1 %v995_v2, %s927_s12  ;;  %59 = vrot.lane.b32.xlu0 %v997_v3, %s927_s12  ;;  %v140_v54 = vsub.s32 2, %v1064_v8  ;;  %v173_v55 = vsub.s32 3, %v1064_v8  ;;  %vm133_vm2 = vcmp.lt.s32.totalorder %v1066_v11, 15  ;;  %vm166_vm3 = vcmp.lt.s32.totalorder %v1066_v11, 1 }
  0x2b   :  { %v1079_v19 = vrot.slane %v1070_v14, %v74_v12  ;;  %v1082_v20 = vrot.slane %v1070_v14, %v107_v13  ;;  %v1089_v23 = vrot.slane %v1073_v17, %v74_v12  ;;  %v1092_v24 = vrot.slane %v1075_v18, %v74_v12 }
  0x2c   :  { %v1095_v27 = vrot.slane %v1073_v17, %v107_v13  ;;  %v1102_v30 = vrot.slane %v1075_v18, %v107_v13  ;;  %v1105_v31 = vrot.slane %v1084_v21, %v74_v12  ;;  %v1112_v35 = vrot.slane %v1084_v21, %v107_v13 }
  0x2d   :  { %v1132_v58 = vrot.slane %v1070_v14, %v140_v54  ;;  %v1136_v59 = vrot.slane %v1070_v14, %v173_v55  ;;  %v1141_v61 = vrot.slane %v1073_v17, %v140_v54  ;;  %v1144_v62 = vrot.slane %v1075_v18, %v140_v54 }
  0x2e   :  { %94 = vrot.lane.b32.xlu1 %v997_v3, %s928_s3  ;;  %92 = vrot.lane.b32.xlu0 %v989_v1, %s928_s3  ;;  %v1147_v63 = vrot.slane %v1084_v21, %v140_v54  ;;  %v1157_v12 = vrot.slane %v1075_v18, %v173_v55  ;;  %vm199_vm4 = vcmp.lt.s32.totalorder %v1066_v11, 127  ;;  %vm265_vm5 = vcmp.lt.s32.totalorder %v1066_v11, 112 }
  0x2f   :  { %vm232_vm6 = vcmp.lt.s32.totalorder %v1066_v11, 113  ;;  %vm298_vm7 = vcmp.lt.s32.totalorder %v1066_v11, 111 }
  0x32   :  { %98 = vrot.lane.b32.xlu1 %v995_v2, %s928_s3  ;;  %96 = vrot.lane.b32.xlu0 %v987_v0, %s928_s3 }
  0x36   :  { %127 = vrot.lane.b32.xlu1 %v997_v3, %s929_s13  ;;  %125 = vrot.lane.b32.xlu0 %v989_v1, %s929_s13 }
  0x3a   :  { %131 = vrot.lane.b32.xlu1 %v995_v2, %s929_s13  ;;  %129 = vrot.lane.b32.xlu0 %v987_v0, %s929_s13 }
  0x3e   :  { %160 = vrot.lane.b32.xlu1 %v997_v3, %s930_s14  ;;  %158 = vrot.lane.b32.xlu0 %v989_v1, %s930_s14 }
  0x42   :  { %164 = vrot.lane.b32.xlu1 %v995_v2, %s930_s14  ;;  %162 = vrot.lane.b32.xlu0 %v987_v0, %s930_s14 }
  0x46   :  { %193 = vrot.lane.b32.xlu1 %v997_v3, %s931_s15  ;;  %191 = vrot.lane.b32.xlu0 %v989_v1, %s931_s15 }
  0x4a   :  { %197 = vrot.lane.b32.xlu1 %v995_v2, %s931_s15  ;;  %195 = vrot.lane.b32.xlu0 %v987_v0, %s931_s15 }
  0x4e   :  { %226 = vrot.lane.b32.xlu1 %v997_v3, %s932_s16  ;;  %224 = vrot.lane.b32.xlu0 %v989_v1, %s932_s16 }
  0x52   :  { %230 = vrot.lane.b32.xlu1 %v995_v2, %s932_s16  ;;  %228 = vrot.lane.b32.xlu0 %v987_v0, %s932_s16 }
  0x56   :  { %259 = vrot.lane.b32.xlu1 %v997_v3, %s933_s17  ;;  %257 = vrot.lane.b32.xlu0 %v989_v1, %s933_s17 }
  0x5a   :  { %263 = vrot.lane.b32.xlu1 %v995_v2, %s933_s17  ;;  %261 = vrot.lane.b32.xlu0 %v987_v0, %s933_s17 }
  0x5e   :  { %292 = vrot.lane.b32.xlu1 %v997_v3, %s936_s18  ;;  %290 = vrot.lane.b32.xlu0 %v989_v1, %s936_s18 }
  0x62   :  { %296 = vrot.lane.b32.xlu1 %v995_v2, %s936_s18  ;;  %294 = vrot.lane.b32.xlu0 %v987_v0, %s936_s18 }
  0x66   :  { %54 = vperm.xlu0 %852, %v51_v6  }
  0x98   :  { %v62_v9 = vpop.permute.xlu1 %61  ;;  %v58_v10 = vpop.permute.xlu0 %57 }
  0x9c   :  { %v64_v15 = vpop.permute.xlu1 %63  ;;  %v60_v16 = vpop.permute.xlu0 %59 }
  0x9d   :  { %v70_v22 = vsel %vm67_vm0, %v58_v10, %v60_v16  ;;  %v71_v28 = vsel %vm67_vm0, %v64_v15, %v58_v10  ;;  %v69_v32 = vsel %vm67_vm0, %v60_v16, %v62_v9  ;;  %v68_v36 = vsel %vm67_vm0, %v62_v9, %v64_v15 }
  0x9e   :  { %v89_v33 = vmul.f32 %v1079_v19, %v70_v22  ;;  %v88_v37 = vmul.f32 %v1089_v23, %v71_v28  ;;  %v90_v41 = vmul.f32 %v1092_v24, %v69_v32  ;;  %v91_v47 = vmul.f32 %v1105_v31, %v68_v36 }
  0x9f   :  { %v1154_v10 = vrot.slane %v1073_v17, %v173_v55  ;;  %v1164_v22 = vrot.slane %v1084_v21, %v173_v55 }
  0xa0   :  { %v95_v25 = vpop.permute.xlu1 %94  ;;  %v93_v26 = vpop.permute.xlu0 %92 }
  0xa1   :  { %v103_v29 = vsel %vm100_vm1, %v93_v26, %v95_v25 }
  0xa2   :  { %v122_v34 = vmul.f32 %v1082_v20, %v103_v29 }
  0xa4   :  { %v99_v38 = vpop.permute.xlu1 %98  ;;  %v97_v39 = vpop.permute.xlu0 %96  ;;  %v775_v40 = vpack.c.bf16 %v122_v34, %v89_v33  ;;  %v206_v33 = vsub.s32 4, %v1064_v8 }
  0xa5   :  { %v104_v42 = vsel %vm100_vm1, %v99_v38, %v93_v26  ;;  %v101_v43 = vsel %vm100_vm1, %v97_v39, %v99_v38  ;;  %v102_v44 = vsel %vm100_vm1, %v95_v25, %v97_v39 }
  0xa6   :  { %v121_v45 = vmul.f32 %v1095_v27, %v104_v42  ;;  %v123_v46 = vmul.f32 %v1102_v30, %v102_v44  ;;  %776 = vmatprep.subr.bf16.mxu0 %v775_v40  ;;  %v124_v48 = vmul.f32 %v1112_v35, %v101_v43 }
  0xa8   :  { %v128_v49 = vpop.permute.xlu1 %127  ;;  %v126_v50 = vpop.permute.xlu0 %125  ;;  %v777_v51 = vpack.c.bf16 %v121_v45, %v88_v37  ;;  %v791_v52 = vpack.c.bf16 %v124_v48, %v91_v47  ;;  %v793_v53 = vpack.c.bf16 %v123_v46, %v90_v41  ;;  %v1183_v48 = vrot.slane %v1073_v17, %v206_v33 }
  0xa9   :  { %v136_v60 = vsel %vm133_vm2, %v126_v50, %v128_v49 }
  0xaa   :  { %778 = vmatpush1.bf16.msra.mxu0 %v777_v51  ;;  %792 = vmatprep.subr.bf16.mxu1 %v791_v52  ;;  %v155_v13 = vmul.f32 %v1132_v58, %v136_v60  ;;  %v1191_v51 = vrot.slane %v1070_v14, %v206_v33  ;;  %v1194_v52 = vrot.slane %v1075_v18, %v206_v33 }
  0xab   :  { %794 = vmatpush1.bf16.msra.mxu1 %v793_v53 }
  0xac   :  { %v132_v56 = vpop.permute.xlu1 %131  ;;  %v130_v57 = vpop.permute.xlu0 %129 }
  0xad   :  { %v137_v7 = vsel %vm133_vm2, %v132_v56, %v126_v50  ;;  %v135_v15 = vsel %vm133_vm2, %v128_v49, %v130_v57  ;;  %v134_v25 = vsel %vm133_vm2, %v130_v57, %v132_v56  ;;  %v1186_v49 = vrot.slane %v1084_v21, %v206_v33 }
  0xae   :  { %v154_v26 = vmul.f32 %v1141_v61, %v137_v7  ;;  %v156_v34 = vmul.f32 %v1144_v62, %v135_v15  ;;  %v157_v39 = vmul.f32 %v1147_v63, %v134_v25  ;;  %v239_v33 = vsub.s32 5, %v1064_v8 }
  0xb0   :  { %v161_v5 = vpop.permute.xlu1 %160  ;;  %v159_v6 = vpop.permute.xlu0 %158 }
  0xb1   :  { %v169_v9 = vsel %vm166_vm3, %v159_v6, %v161_v5 }
  0xb2   :  { %v188_v16 = vmul.f32 %v1136_v59, %v169_v9 }
  0xb4   :  { %v165_v28 = vpop.permute.xlu1 %164  ;;  %v163_v29 = vpop.permute.xlu0 %162  ;;  %v779_v32 = vpack.c.bf16 %v188_v16, %v155_v13 }
  0xb5   :  { %v170_v36 = vsel %vm166_vm3, %v165_v28, %v159_v6  ;;  %v167_v37 = vsel %vm166_vm3, %v163_v29, %v165_v28  ;;  %v168_v38 = vsel %vm166_vm3, %v161_v5, %v163_v29 }
  0xb6   :  { %v187_v40 = vmul.f32 %v1154_v10, %v170_v36  ;;  %v189_v41 = vmul.f32 %v1157_v12, %v168_v38  ;;  %v190_v42 = vmul.f32 %v1164_v22, %v167_v37  ;;  %780 = vmatprep.subr.bf16.mxu0 %v779_v32  ;;  %v272_v32 = vsub.s32 6, %v1064_v8 }
  0xb7   :  { %v1218_v36 = vrot.slane %v1070_v14, %v239_v33 }
  0xb8   :  { %v194_v43 = vpop.permute.xlu1 %193  ;;  %v192_v44 = vpop.permute.xlu0 %191  ;;  %v781_v45 = vpack.c.bf16 %v187_v40, %v154_v26  ;;  %v795_v46 = vpack.c.bf16 %v190_v42, %v157_v39  ;;  %v797_v47 = vpack.c.bf16 %v189_v41, %v156_v34  ;;  %v1215_v34 = vrot.slane %v1084_v21, %v239_v33 }
  0xb9   :  { %v202_v50 = vsel %vm199_vm4, %v192_v44, %v194_v43  ;;  %v1223_v40 = vrot.slane %v1075_v18, %v239_v33  ;;  %v1228_v42 = vrot.slane %v1073_v17, %v272_v32 }
  0xba   :  { %782 = vmatpush1.bf16.msra.mxu0 %v781_v45  ;;  %796 = vmatprep.subr.bf16.mxu1 %v795_v46  ;;  %v220_v55 = vmul.f32 %v1183_v48, %v202_v50  ;;  %v1236_v45 = vrot.slane %v1070_v14, %v272_v32  ;;  %v1239_v46 = vrot.slane %v1075_v18, %v272_v32 }
  0xbb   :  { %798 = vmatpush1.bf16.msra.mxu1 %v797_v47  ;;  %v1242_v47 = vrot.slane %v1073_v17, %v239_v33 }
  0xbc   :  { %v198_v53 = vpop.permute.xlu1 %197  ;;  %v196_v54 = vpop.permute.xlu0 %195  ;;  %v785_v26 = vpack.c.bf16 %v220_v55, %v989_v1 }
  0xbd   :  { %v203_v56 = vsel %vm199_vm4, %v198_v53, %v192_v44  ;;  %v200_v57 = vsel %vm199_vm4, %v196_v54, %v198_v53  ;;  %v201_v60 = vsel %vm199_vm4, %v194_v43, %v196_v54  ;;  %v1233_v44 = vrot.slane %v1084_v21, %v272_v32 }
  0xbe   :  { %v223_v5 = vmul.f32 %v1186_v49, %v203_v56  ;;  %v221_v6 = vmul.f32 %v1191_v51, %v201_v60  ;;  %v222_v7 = vmul.f32 %v1194_v52, %v200_v57 }
  0xc0   :  { %v227_v9 = vpop.permute.xlu1 %226  ;;  %v225_v13 = vpop.permute.xlu0 %224  ;;  %v783_v15 = vpack.c.bf16 %v221_v6, %v997_v3  ;;  %v799_v16 = vpack.c.bf16 %v223_v5, %v995_v2  ;;  %v801_v25 = vpack.c.bf16 %v222_v7, %v987_v0 }
  0xc1   :  { %v235_v53 = vsel %vm232_vm6, %v225_v13, %v227_v9 }
  0xc2   :  { %784 = vmatprep.subr.bf16.mxu0 %v783_v15  ;;  %800 = vmatprep.subr.bf16.mxu1 %v799_v16 }
  0xc3   :  { %786 = vmatpush1.bf16.msra.mxu0 %v785_v26  ;;  %802 = vmatpush1.bf16.msra.mxu1 %v801_v25  ;;  %v253_v25 = vmul.f32 %v1242_v47, %v235_v53  ;;  %v305_v26 = vsub.s32 7, %v1064_v8 }
  0xc4   :  { %v231_v28 = vpop.permute.xlu1 %230  ;;  %v229_v29 = vpop.permute.xlu0 %228 }
  0xc5   :  { %v236_v39 = vsel %vm232_vm6, %v231_v28, %v225_v13  ;;  %v234_v41 = vsel %vm232_vm6, %v227_v9, %v229_v29  ;;  %v233_v50 = vsel %vm232_vm6, %v229_v29, %v231_v28  ;;  %v1274_v8 = vrot.slane %v1073_v17, %v305_v26 }
  0xc6   :  { %v256_v54 = vmul.f32 %v1215_v34, %v236_v39  ;;  %v254_v55 = vmul.f32 %v1218_v36, %v234_v41  ;;  %v255_v15 = vmul.f32 %v1223_v40, %v233_v50  ;;  %v1265_v39 = vrot.slane %v1084_v21, %v305_v26 }
  0xc7   :  { %v1268_v41 = vrot.slane %v1070_v14, %v305_v26 }
  0xc8   :  { %v260_v37 = vpop.permute.xlu1 %259  ;;  %v258_v38 = vpop.permute.xlu0 %257 }
  0xc9   :  { %v268_v43 = vsel %vm265_vm5, %v258_v38, %v260_v37 }
  0xca   :  { %v286_v60 = vmul.f32 %v1228_v42, %v268_v43  ;;  %v1271_v43 = vrot.slane %v1075_v18, %v305_v26 }
  0xcc   :  { %v264_v56 = vpop.permute.xlu1 %263  ;;  %v262_v57 = vpop.permute.xlu0 %261 }
  0xcd   :  { %v269_v5 = vsel %vm265_vm5, %v264_v56, %v258_v38  ;;  %v266_v6 = vsel %vm265_vm5, %v262_v57, %v264_v56  ;;  %v267_v7 = vsel %vm265_vm5, %v260_v37, %v262_v57  ;;  %v789_v37 = vpack.c.bf16 %v286_v60, %v253_v25  ;;  %v1291_v60 = vld [vmem:[%s1502_s1] sm:$0xff]  ;;  %s937_s1 = smov [#allocation7]  }
  0xce   :  { %v289_v9 = vmul.f32 %v1233_v44, %v269_v5  ;;  %v287_v13 = vmul.f32 %v1236_v45, %v267_v7  ;;  %v288_v16 = vmul.f32 %v1239_v46, %v266_v6  ;;  %s761_s22 = sshll.u32 %s937_s1, 4  ;;  %s762_s22 = int_to_ptr.vmem [resolvable:$true] %s761_s22 }
  0xcf   :  { %s897_s23 = scalar_lea.vmem %s762_s22, 512  ;;  %p902_p3 = scmp.lt.s32.totalorder %s762_s22, %s762_s22 }
  0xd0   :  { %v293_v28 = vpop.permute.xlu1 %292  ;;  %v291_v29 = vpop.permute.xlu0 %290  ;;  %v787_v32 = vpack.c.bf16 %v287_v13, %v254_v55  ;;  %v803_v33 = vpack.c.bf16 %v289_v9, %v256_v54  ;;  %v805_v38 = vpack.c.bf16 %v288_v16, %v255_v15  ;;  %p898_p2 = scmp.ne.s32.totalorder %s762_s22, %s897_s23  ;;  %p903_p4 = scmp.lt.s32.totalorder %s897_s23, %s897_s23 }
  0xd1   :  { %v301_v50 = vsel %vm298_vm7, %v291_v29, %v293_v28 }
  0xd2   :  { %788 = vmatprep.subr.bf16.mxu0 %v787_v32  ;;  %804 = vmatprep.subr.bf16.mxu1 %v803_v33  ;;  %v319_v57 = vmul.f32 %v1274_v8, %v301_v50  ;;  %p904_p5 = por %p903_p4, %p902_p3 }
  0xd3   :  { %790 = vmatpush1.bf16.msra.mxu0 %v789_v37  ;;  %806 = vmatpush1.bf16.msra.mxu1 %v805_v38 }
  0xd4   :  { %v297_v53 = vpop.permute.xlu1 %296  ;;  %v295_v54 = vpop.permute.xlu0 %294  ;;  %p905_p6 = pnand %p904_p5, %p898_p2 }
  0xd5   :  { %v302_v21 = vsel %vm298_vm7, %v297_v53, %v291_v29  ;;  %v299_v14 = vsel %vm298_vm7, %v295_v54, %v297_v53  ;;  %v300_v18 = vsel %vm298_vm7, %v293_v28, %v295_v54 }
  0xd6   :  { %v322_v55 = vmul.f32 %v1265_v39, %v302_v21  ;;  %v320_v17 = vmul.f32 %v1268_v41, %v300_v18  ;;  %v321_v56 = vmul.f32 %v1271_v43, %v299_v14 }
  0xd8   :  { %343 = vmatprep.subr.mxu0 %v320_v17  ;;  %414 = vmatprep.subr.mxu1 %v322_v55 }
  0xd9   :  { %344 = vmatpush1.msra.mxu0 %v319_v57  ;;  %415 = vmatpush1.msra.mxu1 %v321_v56 }
  0xda   :  { %771 = vmatmul.mubr.msk.f32.vlgmr.msra.gmra.mrb[0].mxu0 %vm323_vm8, %v1291_v60  ;;  %772 = vmatmul.mubr.msk.f32.vlgmr.msra.gmra.mrb[0].mxu1 %vm323_vm8, %v1291_v60 }
  0xdb   :  { %665 = vmatprep.mubr.f32.mxu0 %v934_v4  ;;  %736 = vmatprep.mubr.f32.mxu1 %v934_v4 }
  0xe5   :  { %v1299_v5 = vpop.permute.xlu0 %54 }
 0x1ad   :  { %v393_v6 = vpop.f32.mrb[0].mxu0  ;;  %v464_v7 = vpop.f32.mrb[0].mxu1 }
 0x1ae   :  { %v394_v15 = vadd.f32 %v393_v6, %v1299_v5  ;;  %v465_v9 = vadd.f32 %v464_v7, %v1299_v5  ;;  %v395_v13 = vpop.f32.mrb[1].mxu0  ;;  %v466_v16 = vpop.f32.mrb[1].mxu1 }
 0x1af   :  { %v396_v28 = vadd.f32 %v395_v13, %v1299_v5  ;;  %v467_v29 = vadd.f32 %v466_v16, %v1299_v5 }
 0x1b0   :  { %v1303_v25 = vmax.f32 %v394_v15, 0.0  ;;  %v1305_v26 = vmax.f32 %v465_v9, 0.0 }
 0x1b1   :  { %v1312_v4 = vmax.f32 %v396_v28, 0.0  ;;  %v1319_v32 = vmax.f32 %v467_v29, 0.0 }
 0x1b2   :  { %477 = vrot.lane.b32.xlu0 %v1305_v26, %s927_s12  ;;  %473 = vrot.lane.b32.xlu1 %v1303_v25, %s927_s12 }
 0x1b6   :  { %489 = vrot.lane.b32.xlu0 %v1303_v25, %s928_s3  ;;  %475 = vrot.lane.b32.xlu1 %v1312_v4, %s927_s12 }
 0x1ba   :  { %493 = vrot.lane.b32.xlu0 %v1305_v26, %s928_s3  ;;  %479 = vrot.lane.b32.xlu1 %v1319_v32, %s927_s12 }
 0x1be   :  { %505 = vrot.lane.b32.xlu0 %v1303_v25, %s929_s13  ;;  %491 = vrot.lane.b32.xlu1 %v1312_v4, %s928_s3 }
 0x1c2   :  { %509 = vrot.lane.b32.xlu0 %v1305_v26, %s929_s13  ;;  %495 = vrot.lane.b32.xlu1 %v1319_v32, %s928_s3 }
 0x1c6   :  { %521 = vrot.lane.b32.xlu0 %v1303_v25, %s930_s14  ;;  %507 = vrot.lane.b32.xlu1 %v1312_v4, %s929_s13 }
 0x1ca   :  { %525 = vrot.lane.b32.xlu0 %v1305_v26, %s930_s14  ;;  %511 = vrot.lane.b32.xlu1 %v1319_v32, %s929_s13 }
 0x1ce   :  { %537 = vrot.lane.b32.xlu0 %v1303_v25, %s931_s15  ;;  %523 = vrot.lane.b32.xlu1 %v1312_v4, %s930_s14 }
 0x1d2   :  { %541 = vrot.lane.b32.xlu0 %v1305_v26, %s931_s15  ;;  %527 = vrot.lane.b32.xlu1 %v1319_v32, %s930_s14 }
 0x1d6   :  { %553 = vrot.lane.b32.xlu0 %v1303_v25, %s932_s16  ;;  %539 = vrot.lane.b32.xlu1 %v1312_v4, %s931_s15 }
 0x1da   :  { %557 = vrot.lane.b32.xlu0 %v1305_v26, %s932_s16  ;;  %543 = vrot.lane.b32.xlu1 %v1319_v32, %s931_s15 }
 0x1de   :  { %569 = vrot.lane.b32.xlu0 %v1303_v25, %s933_s17  ;;  %555 = vrot.lane.b32.xlu1 %v1312_v4, %s932_s16 }
 0x1e2   :  { %573 = vrot.lane.b32.xlu0 %v1305_v26, %s933_s17  ;;  %559 = vrot.lane.b32.xlu1 %v1319_v32, %s932_s16 }
 0x1e6   :  { %585 = vrot.lane.b32.xlu0 %v1303_v25, %s936_s18  ;;  %571 = vrot.lane.b32.xlu1 %v1312_v4, %s933_s17 }
 0x1ea   :  { %589 = vrot.lane.b32.xlu0 %v1305_v26, %s936_s18  ;;  %575 = vrot.lane.b32.xlu1 %v1319_v32, %s933_s17 }
 0x1ee   :  { %587 = vrot.lane.b32.xlu1 %v1312_v4, %s936_s18 }
 0x1f2   :  { %591 = vrot.lane.b32.xlu1 %v1319_v32, %s936_s18 }
 0x224   :  { %v478_v33 = vpop.permute.xlu0 %477  ;;  %v474_v38 = vpop.permute.xlu1 %473 }
 0x228   :  { %v490_v37 = vpop.permute.xlu0 %489  ;;  %v476_v50 = vpop.permute.xlu1 %475 }
 0x229   :  { %v483_v21 = vsel %vm67_vm0, %v474_v38, %v476_v50  ;;  %v482_v15 = vsel %vm67_vm0, %v476_v50, %v478_v33 }
 0x22a   :  { %v486_v17 = vmul.f32 %v483_v21, %v1079_v19 }
 0x22c   :  { %v494_v53 = vpop.permute.xlu0 %493  ;;  %v480_v54 = vpop.permute.xlu1 %479 }
 0x22d   :  { %v481_v6 = vsel %vm67_vm0, %v478_v33, %v480_v54  ;;  %v484_v7 = vsel %vm67_vm0, %v480_v54, %v474_v38  ;;  %v487_v33 = vmul.f32 %v482_v15, %v1092_v24 }
 0x22e   :  { %v485_v29 = vmul.f32 %v484_v7, %v1089_v23  ;;  %v488_v21 = vmul.f32 %v481_v6, %v1105_v31 }
 0x230   :  { %v506_v14 = vpop.permute.xlu0 %505  ;;  %v492_v18 = vpop.permute.xlu1 %491 }
 0x231   :  { %v499_v55 = vsel %vm100_vm1, %v490_v37, %v492_v18  ;;  %v498_v56 = vsel %vm100_vm1, %v492_v18, %v494_v53 }
 0x232   :  { %v502_v57 = vmul.f32 %v499_v55, %v1082_v20  ;;  %v503_v28 = vmul.f32 %v498_v56, %v1102_v30 }
 0x234   :  { %v510_v9 = vpop.permute.xlu0 %509  ;;  %v496_v13 = vpop.permute.xlu1 %495  ;;  %v807_v16 = vpack.c.bf16 %v502_v57, %v486_v17  ;;  %v825_v17 = vpack.c.bf16 %v503_v28, %v487_v33 }
 0x235   :  { %v497_v19 = vsel %vm100_vm1, %v494_v53, %v496_v13  ;;  %v500_v20 = vsel %vm100_vm1, %v496_v13, %v490_v37 }
 0x236   :  { %v501_v38 = vmul.f32 %v500_v20, %v1095_v27  ;;  %v504_v54 = vmul.f32 %v497_v19, %v1112_v35  ;;  %808 = vmatprep.subr.bf16.mxu0 %v807_v16 }
 0x238   :  { %v809_v50 = vpack.c.bf16 %v501_v38, %v485_v29  ;;  %v522_v18 = vpop.permute.xlu0 %521  ;;  %v508_v30 = vpop.permute.xlu1 %507  ;;  %v823_v55 = vpack.c.bf16 %v504_v54, %v488_v21 }
 0x239   :  { %v515_v23 = vsel %vm133_vm2, %v506_v14, %v508_v30  ;;  %v514_v15 = vsel %vm133_vm2, %v508_v30, %v510_v9 }
 0x23a   :  { %810 = vmatpush1.bf16.msra.mxu0 %v809_v50  ;;  %824 = vmatprep.subr.bf16.mxu1 %v823_v55  ;;  %v518_v24 = vmul.f32 %v515_v23, %v1132_v58 }
 0x23b   :  { %826 = vmatpush1.bf16.msra.mxu1 %v825_v17 }
 0x23c   :  { %v526_v37 = vpop.permute.xlu0 %525  ;;  %v512_v53 = vpop.permute.xlu1 %511 }
 0x23d   :  { %v513_v6 = vsel %vm133_vm2, %v510_v9, %v512_v53  ;;  %v516_v7 = vsel %vm133_vm2, %v512_v53, %v506_v14  ;;  %v519_v9 = vmul.f32 %v514_v15, %v1144_v62 }
 0x23e   :  { %v517_v20 = vmul.f32 %v516_v7, %v1141_v61  ;;  %v520_v29 = vmul.f32 %v513_v6, %v1147_v63 }
 0x240   :  { %v538_v31 = vpop.permute.xlu0 %537  ;;  %v524_v27 = vpop.permute.xlu1 %523 }
 0x241   :  { %v531_v35 = vsel %vm166_vm3, %v522_v18, %v524_v27  ;;  %v530_v56 = vsel %vm166_vm3, %v524_v27, %v526_v37 }
 0x242   :  { %v534_v57 = vmul.f32 %v531_v35, %v1136_v59  ;;  %v535_v19 = vmul.f32 %v530_v56, %v1157_v12 }
 0x244   :  { %v542_v13 = vpop.permute.xlu0 %541  ;;  %v528_v16 = vpop.permute.xlu1 %527  ;;  %v811_v28 = vpack.c.bf16 %v534_v57, %v518_v24  ;;  %v829_v50 = vpack.c.bf16 %v535_v19, %v519_v9 }
 0x245   :  { %v529_v58 = vsel %vm166_vm3, %v526_v37, %v528_v16  ;;  %v532_v59 = vsel %vm166_vm3, %v528_v16, %v522_v18 }
 0x246   :  { %v533_v14 = vmul.f32 %v532_v59, %v1154_v10  ;;  %v536_v21 = vmul.f32 %v529_v58, %v1164_v22  ;;  %812 = vmatprep.subr.bf16.mxu0 %v811_v28 }
 0x248   :  { %v813_v38 = vpack.c.bf16 %v533_v14, %v517_v20  ;;  %v554_v54 = vpop.permute.xlu0 %553  ;;  %v540_v12 = vpop.permute.xlu1 %539  ;;  %v827_v33 = vpack.c.bf16 %v536_v21, %v520_v29 }
 0x249   :  { %v546_v30 = vsel %vm199_vm4, %v540_v12, %v542_v13  ;;  %v547_v61 = vsel %vm199_vm4, %v538_v31, %v540_v12 }
 0x24a   :  { %v549_v63 = vmul.f32 %v547_v61, %v1183_v48  ;;  %v550_v10 = vmul.f32 %v546_v30, %v1191_v51  ;;  %814 = vmatpush1.bf16.msra.mxu0 %v813_v38  ;;  %828 = vmatprep.subr.bf16.mxu1 %v827_v33 }
 0x24b   :  { %830 = vmatpush1.bf16.msra.mxu1 %v829_v50 }
 0x24c   :  { %v817_v62 = vpack.c.bf16 %v549_v63, %v1303_v25  ;;  %v558_v22 = vpop.permute.xlu0 %557  ;;  %v544_v18 = vpop.permute.xlu1 %543  ;;  %v815_v55 = vpack.c.bf16 %v550_v10, %v1312_v4 }
 0x24d   :  { %v545_v17 = vsel %vm199_vm4, %v542_v13, %v544_v18  ;;  %v548_v37 = vsel %vm199_vm4, %v544_v18, %v538_v31 }
 0x24e   :  { %v551_v53 = vmul.f32 %v545_v17, %v1194_v52  ;;  %v552_v48 = vmul.f32 %v548_v37, %v1186_v49  ;;  %816 = vmatprep.subr.bf16.mxu0 %v815_v55 }
 0x24f   :  { %818 = vmatpush1.bf16.msra.mxu0 %v817_v62 }
 0x250   :  { %v833_v51 = vpack.c.bf16 %v551_v53, %v1305_v26  ;;  %v570_v23 = vpop.permute.xlu0 %569  ;;  %v556_v25 = vpop.permute.xlu1 %555  ;;  %v831_v27 = vpack.c.bf16 %v552_v48, %v1319_v32 }
 0x251   :  { %v562_v24 = vsel %vm232_vm6, %v556_v25, %v558_v22  ;;  %v563_v52 = vsel %vm232_vm6, %v554_v54, %v556_v25 }
 0x252   :  { %832 = vmatprep.subr.bf16.mxu1 %v831_v27  ;;  %v565_v56 = vmul.f32 %v563_v52, %v1242_v47  ;;  %v566_v32 = vmul.f32 %v562_v24, %v1218_v36 }
 0x253   :  { %834 = vmatpush1.bf16.msra.mxu1 %v833_v51 }
 0x254   :  { %v574_v4 = vpop.permute.xlu0 %573  ;;  %v560_v35 = vpop.permute.xlu1 %559 }
 0x255   :  { %v561_v15 = vsel %vm232_vm6, %v558_v22, %v560_v35  ;;  %v564_v13 = vsel %vm232_vm6, %v560_v35, %v554_v54 }
 0x256   :  { %v567_v47 = vmul.f32 %v561_v15, %v1223_v40 }
 0x258   :  { %v572_v31 = vpop.permute.xlu1 %571  ;;  %v586_v57 = vpop.permute.xlu0 %585 }
 0x259   :  { %v578_v49 = vsel %vm265_vm5, %v572_v31, %v574_v4  ;;  %v579_v26 = vsel %vm265_vm5, %v570_v23, %v572_v31 }
 0x25a   :  { %v581_v6 = vmul.f32 %v579_v26, %v1228_v42  ;;  %v582_v7 = vmul.f32 %v578_v49, %v1236_v45  ;;  %v568_v42 = vmul.f32 %v564_v13, %v1215_v34 }
 0x25c   :  { %v821_v16 = vpack.c.bf16 %v581_v6, %v565_v56  ;;  %v576_v28 = vpop.permute.xlu1 %575  ;;  %v819_v19 = vpack.c.bf16 %v582_v7, %v566_v32  ;;  %v590_v20 = vpop.permute.xlu0 %589 }
 0x25d   :  { %v577_v58 = vsel %vm265_vm5, %v574_v4, %v576_v28  ;;  %v580_v36 = vsel %vm265_vm5, %v576_v28, %v570_v23 }
 0x25e   :  { %v583_v45 = vmul.f32 %v577_v58, %v1239_v46  ;;  %v584_v59 = vmul.f32 %v580_v36, %v1233_v44  ;;  %820 = vmatprep.subr.bf16.mxu0 %v819_v19 }
 0x25f   :  { %822 = vmatpush1.bf16.msra.mxu0 %v821_v16 }
 0x260   :  { %v837_v29 = vpack.c.bf16 %v583_v45, %v567_v47  ;;  %v588_v14 = vpop.permute.xlu1 %587  ;;  %v835_v21 = vpack.c.bf16 %v584_v59, %v568_v42 }
 0x261   :  { %v594_v9 = vsel %vm298_vm7, %v588_v14, %v590_v20  ;;  %v595_v38 = vsel %vm298_vm7, %v586_v57, %v588_v14 }
 0x262   :  { %v597_v40 = vmul.f32 %v595_v38, %v1274_v8  ;;  %v598_v34 = vmul.f32 %v594_v9, %v1268_v41  ;;  %836 = vmatprep.subr.bf16.mxu1 %v835_v21 }
 0x263   :  { %838 = vmatpush1.bf16.msra.mxu1 %v837_v29 }
 0x264   :  { %617 = vmatprep.subr.mxu0 %v598_v34  ;;  %v592_v44 = vpop.permute.xlu1 %591 }
 0x265   :  { %v593_v46 = vsel %vm298_vm7, %v590_v20, %v592_v44  ;;  %v596_v54 = vsel %vm298_vm7, %v592_v44, %v586_v57  ;;  %618 = vmatpush1.msra.mxu0 %v597_v40 }
 0x266   :  { %v599_v12 = vmul.f32 %v593_v46, %v1271_v43  ;;  %v600_v33 = vmul.f32 %v596_v54, %v1265_v39  ;;  %773 = vmatmul.mubr.msk.f32.vlgmr.msra.gmra.mrb[2].mxu0 %vm323_vm8, %v1291_v60 }
 0x268   :  { %688 = vmatprep.subr.mxu1 %v600_v33 }
 0x269   :  { %689 = vmatpush1.msra.mxu1 %v599_v12 }
 0x26a   :  { %774 = vmatmul.mubr.msk.f32.vlgmr.msra.gmra.mrb[2].mxu1 %vm323_vm8, %v1291_v60 }
 0x339   :  { %v667_v41 = vpop.f32.mrb[2].mxu0 }
 0x33a   :  { %v668_v8 = vadd.f32 %v667_v41, %v1299_v5  ;;  %v669_v50 = vpop.f32.mrb[3].mxu0 }
 0x33b   :  { %v670_v11 = vadd.f32 %v669_v50, %v1299_v5 }
 0x33c   :  { %v743_v30 = vadd.f32 %v668_v8, %v989_v1 }
 0x33d   :  { %v744_v43 = vadd.f32 %v670_v11, %v997_v3  ;;  %v738_v61 = vpop.f32.mrb[2].mxu1 }
 0x33e   :  { %v747_v39 = vmax.f32 %v743_v30, 0.0  ;;  %v739_v63 = vadd.f32 %v738_v61, %v1299_v5  ;;  %v740_v10 = vpop.f32.mrb[3].mxu1 }
 0x33f   :  { %v748_v62 = vmax.f32 %v744_v43, 0.0  ;;  %v741_v22 = vadd.f32 %v740_v10, %v1299_v5 }
 0x340   :  { %751 = vst [vmem:[#allocation7] sm:$0xff] %v747_v39  ;;  %v745_v60 = vadd.f32 %v739_v63, %v987_v0 }
 0x341   :  { %752 = vst [vmem:[#allocation7 + $0x8] sm:$0xff] %v748_v62  ;;  %v746_v18 = vadd.f32 %v741_v22, %v995_v2 }
 0x342   :  { %v749_v55 = vmax.f32 %v745_v60, 0.0 }
 0x343   :  { %v750_v1 = vmax.f32 %v746_v18, 0.0 }
 0x344   :  { %753 = vst [vmem:[#allocation7 + $0x10] sm:$0xff] %v749_v55 }
 0x345   :  { %754 = vst [vmem:[#allocation7 + $0x18] sm:$0xff] %v750_v1 }
 0x346   :  { %908 = shalt.err (!%p905_p6)
}
 0x347   :  { %s909_s26 = scalar_lea.hbm %s1505_s4, 512 }
 0x348   :  { %p910_p7 = scmp.ne.s32.totalorder %s1505_s4, %s909_s26  ;;  %p913_p8 = scmp.lt.u32.totalorder %s909_s26, %s1505_s4 }
 0x34a   :  { %p915_p9 = pnand %p913_p8, %p910_p7 }
 0x34c   :  { %918 = shalt.err (!%p915_p9)
}
 0x34d   :  { %764 = dma.vmem_to_hbm [thread:$0]  %s762_s22, 512, %s1505_s4, [#allocation4]  }
 0x34e   :  { %923 = dma.done.wait [#allocation4], 512  }
 0x34f   :  { %924 = vsyncadd [#allocation4], 4294966784 }
 0x350   :  { %768 = vsyncpa [#allocation3], 1 }
 0x351   :  { %769 = vsyncpa [#allocation6], 1 }
 0x352   :  { %770 = vsyncpa [#allocation4], 1 }

</bundles_post_ra>
